<compile_context>
chip_gen: v7x
topology: tpu7x:2x2x1
jax: 0.10.0
libtpu: 0.0.40
codegen_flags: <defaults>
</compile_context>

<pallas_src>
import functools
import math

import jax
import jax.numpy as jnp
from jax.experimental import pallas as pl
from jax.experimental.pallas import tpu as pltpu


def _round_up(x, n):
    return ((x + n - 1) // n) * n


def _vmem_capacity_bytes():
    """Physical VMEM of the local TPU; fall back to v7x's 64 MiB (smallest)."""
    try:
        info = pltpu.get_tpu_info()
        cap = getattr(info, "vmem_capacity_bytes", None)
        if cap:
            return int(cap)
    except Exception:
        pass
    return 64 * 1024 * 1024


def _tile_vmem_bytes(tm, cp, ocp, k, kg, halo):
    """Conservative per-step VMEM footprint for tile width `tm` (lanes)."""
    return (cp * (tm + halo) * 2 * 2      # bf16 input window block, double-buffered
            + ocp * k * 2 * 2             # bf16 weights (2 pipeline buffers)
            + ocp * tm * 4 * 2            # f32 output block, double-buffered
            + kg * tm * 2)                # bf16 mini im2col scratch (single copy)


def _select_tile(m_valid, cp, ocp, k, kg, halo, cap):
    """Largest 128-multiple tile width that fits ~55% of physical VMEM."""
    budget = (cap * 11) // 20
    m_up = _round_up(m_valid, 128)
    for cand in (2048, 1536, 1024, 768, 512, 384, 256, 128):
        cand = min(cand, m_up)
        if _tile_vmem_bytes(cand, cp, ocp, k, kg, halo) <= budget:
            return cand
    return 128


# ----------------------------- kernels -------------------------------------


def _conv_kernel_direct(x_ref, w_ref, o_ref, *, cp, taps, tm):
    """Per-tap accumulating matmuls straight from shifted input slices.

    Used when Cp alone already gives a deep MXU K: no im2col scratch and no
    extra vector-store traffic; accumulation happens in the f32 output block.

    x_ref: [Cp, TM+halo] bf16 input window for this (batch, m-tile)
    w_ref: [OCp, K]      bf16, K = KT*Cp, tap-major / channel-minor
    o_ref: [OCp, TM]     f32  lane-dense output tile
    """
    for t, off in enumerate(taps):                      # static unroll (KH*KW)
        part = jnp.dot(w_ref[:, t * cp:(t + 1) * cp],
                       x_ref[:, off:off + tm],
                       preferred_element_type=jnp.float32)
        if t == 0:
            o_ref[...] = part
        else:
            o_ref[...] += part


def _conv_kernel_grouped(x_ref, w_ref, o_ref, a_ref, *, cp, taps, tm, group):
    """Taps grouped so every matmul sees K >= ~256 (small-Cp case).

    a_ref: [group*Cp, TM] bf16 mini im2col scratch (bounded, unlike the old
    full [K, OH*W] slab).  For the demo shapes all KH*KW taps fit one group,
    so there is exactly one matmul per (batch, m-tile).
    """
    kt = len(taps)
    first = True
    for g0 in range(0, kt, group):                      # static unroll
        g_taps = taps[g0:g0 + group]
        kg = len(g_taps) * cp
        for r, off in enumerate(g_taps):
            a_ref[r * cp:(r + 1) * cp, :] = x_ref[:, off:off + tm]
        part = jnp.dot(w_ref[:, g0 * cp:g0 * cp + kg],
                       a_ref[0:kg, :],
                       preferred_element_type=jnp.float32)
        if first:
            o_ref[...] = part
            first = False
        else:
            o_ref[...] += part


# ------------------------- host-side wrapper --------------------------------


def _prepare_weight(weight):
    """[OC, C, KH, KW] -> [OCp, KH*KW*Cp] bf16, tap-major / channel-minor."""
    oc, c, kh, kw = weight.shape
    cp = _round_up(c, 16)
    ocp = _round_up(oc, 16)                 # bf16 sublane pack (was 8)
    w_t = jnp.transpose(weight, (0, 2, 3, 1))                  # [OC, KH, KW, C]
    w_t = jnp.pad(w_t, ((0, ocp - oc), (0, 0), (0, 0), (0, cp - c)))
    return w_t.reshape(ocp, kh * kw * cp).astype(jnp.bfloat16)


def _sparse_conv2d_prepared(x, w2d, *, oc, c, kh, kw,
                            stride=1, padding=1, dilation=1):
    """SparseConv2D.forward (Training / Inference_Vanilla, no bias).

    x:   [B, C, H, W] float32 (NCHW)
    w2d: [OCp, KH*KW*Cp] bf16 prepared weights (see _prepare_weight)
    returns [B, OC, OH, OW] float32
    """
    if stride != 1:
        # TODO(synk): strided conv needs a different in-kernel gather.
        raise NotImplementedError("fused Pallas path implements stride=1 only")

    B, C, H, W = x.shape
    assert C == c
    p, d = padding, dilation
    Hp, Wp = H + 2 * p, W + 2 * p
    OH = Hp - d * (kh - 1)              # floor((H+2p-(d*(KH-1)+1))/1 + 1)
    OW = Wp - d * (kw - 1)

    Cp = _round_up(c, 16)
    OCp, K = w2d.shape
    KT = kh * kw
    assert K == KT * Cp

    # Flat-index offset of each kernel tap (kh, kw) in the padded input row.
    taps = tuple(i * d * Wp + j * d for i in range(kh) for j in range(kw))
    off_max = taps[-1]
    halo = _round_up(off_max, 128)

    m_valid = OH * Wp                   # "wide" columns (junk ow in [OW,Wp))

    # Tap grouping: target MXU K-depth of ~256 (good on v5e/v6e/v7x).
    group = max(1, min(KT, -(-256 // Cp)))
    use_scratch = group > 1
    kg_max = group * Cp if use_scratch else 0

    cap = _vmem_capacity_bytes()
    tm = _select_tile(m_valid, Cp, OCp, K, kg_max, halo, cap)
    n_m = -(-m_valid // tm)
    m_pad = n_m * tm
    w_in = tm + halo

    need = _tile_vmem_bytes(tm, Cp, OCp, K, kg_max, halo)
    vmem_limit = int(min(cap * 9 // 10, max(2 * need + (4 << 20), 32 << 20)))

    # --- glue: one fused pre-pass (bf16 cast FIRST -> pad -> flatten -> window)
    x_bf = x.astype(jnp.bfloat16)
    x_pad = jnp.pad(x_bf, ((0, 0), (0, Cp - C), (p, p), (p, p)))
    x_flat = x_pad.reshape(B, Cp, Hp * Wp)
    flat_len = (n_m - 1) * tm + w_in
    x_flat = jnp.pad(x_flat, ((0, 0), (0, 0), (0, flat_len - Hp * Wp)))
    # Overlapping [Cp, tm+halo] windows, one per output-column tile.  Static
    # slices (XLA fuses them with the pad/cast); keeps *all* in-kernel slicing
    # static so no dynamic lane offsets are needed on the minor dim.
    x_win = jnp.stack([x_flat[:, :, j * tm:j * tm + w_in] for j in range(n_m)],
                      axis=1)                                  # [B, n_m, Cp, w_in]

    if use_scratch:
        kernel = functools.partial(_conv_kernel_grouped,
                                   cp=Cp, taps=taps, tm=tm, group=group)
        scratch_shapes = [pltpu.VMEM((kg_max, tm), jnp.bfloat16)]
    else:
        kernel = functools.partial(_conv_kernel_direct, cp=Cp, taps=taps, tm=tm)
        scratch_shapes = []

    out_wide = pl.pallas_call(
        kernel,
        out_shape=jax.ShapeDtypeStruct((B, OCp, m_pad), jnp.float32),
        grid=(B, n_m),
        in_specs=[
            pl.BlockSpec((None, None, Cp, w_in), lambda b, j: (b, j, 0, 0)),
            pl.BlockSpec((OCp, K), lambda b, j: (0, 0)),       # resident weights
        ],
        out_specs=pl.BlockSpec((None, OCp, tm), lambda b, j: (b, 0, j)),
        scratch_shapes=scratch_shapes,
        compiler_params=pltpu.CompilerParams(
            dimension_semantics=("parallel", "parallel"),
            vmem_limit_bytes=vmem_limit,
        ),
    )(x_win, w2d)

    # Output is already channel-major: drop padded OC rows, the lane-padding
    # tail and the (Wp-OW) junk columns.  No transpose needed.
    out = out_wide[:, :oc, :OH * Wp].reshape(B, oc, OH, Wp)[:, :, :, :OW]
    return out


def sparse_conv2d_forward(x, weight, *, stride=1, padding=1, dilation=1):
    """Convenience wrapper taking the raw [OC, C, KH, KW] weight."""
    oc, c, kh, kw = weight.shape
    w2d = _prepare_weight(weight)
    return _sparse_conv2d_prepared(x, w2d, oc=oc, c=c, kh=kh, kw=kw,
                                   stride=stride, padding=padding,
                                   dilation=dilation)


class SparseModelJAX:
    """Mirror of SparseModel wrapping one SparseConv2D layer (no bias).

    Note: the reference SparseModel.forward() returns None; the meaningful
    compute lives in SparseConv2D, which in Training/Inference_Vanilla mode is
    exactly nn.Conv2d without bias.  That is what is kernelized here.
    """

    def __init__(self, in_channels, out_channels, kernel_size,
                 stride=1, padding=1, dilation=1, key=None):
        self.stride = stride
        self.padding = padding
        self.dilation = dilation
        k = jax.random.PRNGKey(42) if key is None else key
        fan_in = in_channels * kernel_size * kernel_size
        bound = 1.0 / math.sqrt(fan_in)
        self.weight = jax.random.uniform(
            k, (out_channels, in_channels, kernel_size, kernel_size),
            minval=-bound, maxval=bound, dtype=jnp.float32)
        # Hoisted out of forward: transpose/pad/reshape/bf16 cast done once.
        self.w2d = _prepare_weight(self.weight)
        self._fwd = jax.jit(functools.partial(
            _sparse_conv2d_prepared,
            oc=out_channels, c=in_channels, kh=kernel_size, kw=kernel_size,
            stride=stride, padding=padding, dilation=dilation))

    def __call__(self, x):
        return self._fwd(x, self.w2d)


if __name__ == "__main__":
    key = jax.random.PRNGKey(0)
    kx, kwt = jax.random.split(key)

    B, C, H, W = 2, 4, 16, 16
    OC, Ksz = 8, 3

    x = jax.random.normal(kx, (B, C, H, W), dtype=jnp.float32)
    model = SparseModelJAX(C, OC, Ksz, stride=1, padding=1, dilation=1, key=kwt)

    out = jax.block_until_ready(model(x))

    # Reference: identical math (bf16-rounded operands, f32 accumulation).
    xr = x.astype(jnp.bfloat16).astype(jnp.float32)
    wr = model.weight.astype(jnp.bfloat16).astype(jnp.float32)
    ref = jax.lax.conv_general_dilated(
        xr, wr, window_strides=(1, 1), padding=((1, 1), (1, 1)),
        dimension_numbers=("NCHW", "OIHW", "NCHW"),
        precision=jax.lax.Precision.HIGHEST)

    assert out.shape == (B, OC, H, W), out.shape
    max_err = float(jnp.max(jnp.abs(out - ref)))
    assert jnp.allclose(out, ref, atol=1e-3, rtol=1e-3), max_err

    print("KERNEL_OK")
</pallas_src>

<mosaic_0001>
module attributes {stable_mosaic.version = 11 : i64} {
  func.func @_conv_kernel_grouped(%arg0: i32, %arg1: i32, %arg2: memref<1x1x16x512xbf16, #tpu.memory_space<vmem>>, %arg3: memref<16x144xbf16, #tpu.memory_space<vmem>>, %arg4: memref<1x16x384xf32, #tpu.memory_space<vmem>>, %arg5: memref<144x384xbf16, #tpu.memory_space<vmem>>) attributes {dimension_semantics = [#tpu.dimension_semantics<parallel>, #tpu.dimension_semantics<parallel>], iteration_bounds = array<i64: 2, 1>, scalar_prefetch = 0 : i64, scratch_operands = 1 : i64, tpu.core_type = #tpu.core_type<tc>, window_params = [{transform_indices = @transform_0, window_bounds = array<i64: 1, 1, 16, 512>}, {pipeline_mode = #tpu.pipeline_mode<synchronous>, transform_indices = @transform_1, window_bounds = array<i64: 16, 144>}, {transform_indices = @transform_2, window_bounds = array<i64: 1, 16, 384>}]} {
    %c0 = arith.constant 0 : index
    %c0_0 = arith.constant 0 : index
    %c0_1 = arith.constant 0 : index
    %c0_2 = arith.constant 0 : index
    %0 = vector.load %arg2[%c0, %c0_0, %c0_1, %c0_2] : memref<1x1x16x512xbf16, #tpu.memory_space<vmem>>, vector<1x1x16x384xbf16>
    %1 = vector.shape_cast %0 : vector<1x1x16x384xbf16> to vector<16x384xbf16>
    %c0_3 = arith.constant 0 : index
    %c0_4 = arith.constant 0 : index
    %2 = vector.load %arg5[%c0_3, %c0_4] : memref<144x384xbf16, #tpu.memory_space<vmem>>, vector<16x384xbf16>
    tpu.vector_store %arg5[%c0_3, %c0_4], %1 {strides = array<i32>} : memref<144x384xbf16, #tpu.memory_space<vmem>>, vector<16x384xbf16>,
    %c0_5 = arith.constant 0 : index
    %c0_6 = arith.constant 0 : index
    %c0_7 = arith.constant 0 : index
    %c1 = arith.constant 1 : index
    %3 = vector.load %arg2[%c0_5, %c0_6, %c0_7, %c1] : memref<1x1x16x512xbf16, #tpu.memory_space<vmem>>, vector<1x1x16x384xbf16>
    %4 = vector.shape_cast %3 : vector<1x1x16x384xbf16> to vector<16x384xbf16>
    %c16 = arith.constant 16 : index
    %c0_8 = arith.constant 0 : index
    %5 = vector.load %arg5[%c16, %c0_8] : memref<144x384xbf16, #tpu.memory_space<vmem>>, vector<16x384xbf16>
    tpu.vector_store %arg5[%c16, %c0_8], %4 {strides = array<i32>} : memref<144x384xbf16, #tpu.memory_space<vmem>>, vector<16x384xbf16>,
    %c0_9 = arith.constant 0 : index
    %c0_10 = arith.constant 0 : index
    %c0_11 = arith.constant 0 : index
    %c2 = arith.constant 2 : index
    %6 = vector.load %arg2[%c0_9, %c0_10, %c0_11, %c2] : memref<1x1x16x512xbf16, #tpu.memory_space<vmem>>, vector<1x1x16x384xbf16>
    %7 = vector.shape_cast %6 : vector<1x1x16x384xbf16> to vector<16x384xbf16>
    %c32 = arith.constant 32 : index
    %c0_12 = arith.constant 0 : index
    %8 = vector.load %arg5[%c32, %c0_12] : memref<144x384xbf16, #tpu.memory_space<vmem>>, vector<16x384xbf16>
    tpu.vector_store %arg5[%c32, %c0_12], %7 {strides = array<i32>} : memref<144x384xbf16, #tpu.memory_space<vmem>>, vector<16x384xbf16>,
    %c0_13 = arith.constant 0 : index
    %c0_14 = arith.constant 0 : index
    %c0_15 = arith.constant 0 : index
    %c18 = arith.constant 18 : index
    %9 = vector.load %arg2[%c0_13, %c0_14, %c0_15, %c18] : memref<1x1x16x512xbf16, #tpu.memory_space<vmem>>, vector<1x1x16x384xbf16>
    %10 = vector.shape_cast %9 : vector<1x1x16x384xbf16> to vector<16x384xbf16>
    %c48 = arith.constant 48 : index
    %c0_16 = arith.constant 0 : index
    %11 = vector.load %arg5[%c48, %c0_16] : memref<144x384xbf16, #tpu.memory_space<vmem>>, vector<16x384xbf16>
    tpu.vector_store %arg5[%c48, %c0_16], %10 {strides = array<i32>} : memref<144x384xbf16, #tpu.memory_space<vmem>>, vector<16x384xbf16>,
    %c0_17 = arith.constant 0 : index
    %c0_18 = arith.constant 0 : index
    %c0_19 = arith.constant 0 : index
    %c19 = arith.constant 19 : index
    %12 = vector.load %arg2[%c0_17, %c0_18, %c0_19, %c19] : memref<1x1x16x512xbf16, #tpu.memory_space<vmem>>, vector<1x1x16x384xbf16>
    %13 = vector.shape_cast %12 : vector<1x1x16x384xbf16> to vector<16x384xbf16>
    %c64 = arith.constant 64 : index
    %c0_20 = arith.constant 0 : index
    %14 = vector.load %arg5[%c64, %c0_20] : memref<144x384xbf16, #tpu.memory_space<vmem>>, vector<16x384xbf16>
    tpu.vector_store %arg5[%c64, %c0_20], %13 {strides = array<i32>} : memref<144x384xbf16, #tpu.memory_space<vmem>>, vector<16x384xbf16>,
    %c0_21 = arith.constant 0 : index
    %c0_22 = arith.constant 0 : index
    %c0_23 = arith.constant 0 : index
    %c20 = arith.constant 20 : index
    %15 = vector.load %arg2[%c0_21, %c0_22, %c0_23, %c20] : memref<1x1x16x512xbf16, #tpu.memory_space<vmem>>, vector<1x1x16x384xbf16>
    %16 = vector.shape_cast %15 : vector<1x1x16x384xbf16> to vector<16x384xbf16>
    %c80 = arith.constant 80 : index
    %c0_24 = arith.constant 0 : index
    %17 = vector.load %arg5[%c80, %c0_24] : memref<144x384xbf16, #tpu.memory_space<vmem>>, vector<16x384xbf16>
    tpu.vector_store %arg5[%c80, %c0_24], %16 {strides = array<i32>} : memref<144x384xbf16, #tpu.memory_space<vmem>>, vector<16x384xbf16>,
    %c0_25 = arith.constant 0 : index
    %c0_26 = arith.constant 0 : index
    %c0_27 = arith.constant 0 : index
    %c36 = arith.constant 36 : index
    %18 = vector.load %arg2[%c0_25, %c0_26, %c0_27, %c36] : memref<1x1x16x512xbf16, #tpu.memory_space<vmem>>, vector<1x1x16x384xbf16>
    %19 = vector.shape_cast %18 : vector<1x1x16x384xbf16> to vector<16x384xbf16>
    %c96 = arith.constant 96 : index
    %c0_28 = arith.constant 0 : index
    %20 = vector.load %arg5[%c96, %c0_28] : memref<144x384xbf16, #tpu.memory_space<vmem>>, vector<16x384xbf16>
    tpu.vector_store %arg5[%c96, %c0_28], %19 {strides = array<i32>} : memref<144x384xbf16, #tpu.memory_space<vmem>>, vector<16x384xbf16>,
    %c0_29 = arith.constant 0 : index
    %c0_30 = arith.constant 0 : index
    %c0_31 = arith.constant 0 : index
    %c37 = arith.constant 37 : index
    %21 = vector.load %arg2[%c0_29, %c0_30, %c0_31, %c37] : memref<1x1x16x512xbf16, #tpu.memory_space<vmem>>, vector<1x1x16x384xbf16>
    %22 = vector.shape_cast %21 : vector<1x1x16x384xbf16> to vector<16x384xbf16>
    %c112 = arith.constant 112 : index
    %c0_32 = arith.constant 0 : index
    %23 = vector.load %arg5[%c112, %c0_32] : memref<144x384xbf16, #tpu.memory_space<vmem>>, vector<16x384xbf16>
    tpu.vector_store %arg5[%c112, %c0_32], %22 {strides = array<i32>} : memref<144x384xbf16, #tpu.memory_space<vmem>>, vector<16x384xbf16>,
    %c0_33 = arith.constant 0 : index
    %c0_34 = arith.constant 0 : index
    %c0_35 = arith.constant 0 : index
    %c38 = arith.constant 38 : index
    %24 = vector.load %arg2[%c0_33, %c0_34, %c0_35, %c38] : memref<1x1x16x512xbf16, #tpu.memory_space<vmem>>, vector<1x1x16x384xbf16>
    %25 = vector.shape_cast %24 : vector<1x1x16x384xbf16> to vector<16x384xbf16>
    %c128 = arith.constant 128 : index
    %c0_36 = arith.constant 0 : index
    %26 = vector.load %arg5[%c128, %c0_36] : memref<144x384xbf16, #tpu.memory_space<vmem>>, vector<16x384xbf16>
    tpu.vector_store %arg5[%c128, %c0_36], %25 {strides = array<i32>} : memref<144x384xbf16, #tpu.memory_space<vmem>>, vector<16x384xbf16>,
    %c0_37 = arith.constant 0 : index
    %c0_38 = arith.constant 0 : index
    %27 = vector.load %arg3[%c0_37, %c0_38] : memref<16x144xbf16, #tpu.memory_space<vmem>>, vector<16x144xbf16>
    %c0_39 = arith.constant 0 : index
    %c0_40 = arith.constant 0 : index
    %28 = vector.load %arg5[%c0_39, %c0_40] : memref<144x384xbf16, #tpu.memory_space<vmem>>, vector<144x384xbf16>
    %cst = arith.constant dense<0.000000e+00> : vector<16x384xf32>
    %29 = tpu.matmul %27, %28, %cst {dimension_numbers = #tpu.dot_dimension_numbers<[1], [0], [0], [1], [0, 0, 1, 1], [], []>} : vector<16x144xbf16>, vector<144x384xbf16>, vector<16x384xf32> -> vector<16x384xf32>
    %c0_41 = arith.constant 0 : index
    %c0_42 = arith.constant 0 : index
    %c0_43 = arith.constant 0 : index
    %30 = vector.load %arg4[%c0_41, %c0_42, %c0_43] : memref<1x16x384xf32, #tpu.memory_space<vmem>>, vector<1x16x384xf32>
    %31 = vector.shape_cast %30 : vector<1x16x384xf32> to vector<16x384xf32>
    %32 = vector.shape_cast %29 : vector<16x384xf32> to vector<1x16x384xf32>
    tpu.vector_store %arg4[%c0_41, %c0_42, %c0_43], %32 {strides = array<i32>} : memref<1x16x384xf32, #tpu.memory_space<vmem>>, vector<1x16x384xf32>,
    return
  }
  func.func @transform_0(%arg0: i32, %arg1: i32) -> (i32, i32, i32, i32) {
    %c0_i32 = arith.constant 0 : i32
    %c0_i32_0 = arith.constant 0 : i32
    %c0_i32_1 = arith.constant 0 : i32
    return %arg0, %arg1, %c0_i32, %c0_i32_0 : i32, i32, i32, i32
  }
  func.func @transform_1(%arg0: i32, %arg1: i32) -> (i32, i32) {
    %c0_i32 = arith.constant 0 : i32
    %c0_i32_0 = arith.constant 0 : i32
    %c0_i32_1 = arith.constant 0 : i32
    return %c0_i32, %c0_i32_0 : i32, i32
  }
  func.func @transform_2(%arg0: i32, %arg1: i32) -> (i32, i32, i32) {
    %c0_i32 = arith.constant 0 : i32
    %c0_i32_0 = arith.constant 0 : i32
    return %arg0, %c0_i32, %arg1 : i32, i32, i32
  }
}

</mosaic_0001>

<bundles_post_ra>
// kernel: _sparse_conv2d_prepared.1
= control target key start
LH: loop header
LB: loop body
LE: loop exit
PB: predicated region body
PF: predicated region fallthrough
CT: control target
= control target key end

     0   :  { %s873_s9 = smov 0   ;;  %s875_s10 = smov 0   ;;  %s925_s0 = inlined_call_operand.vmem [shape: bf16[2,1,16,512], index: 0, kind: input, shape index: {}]   ;;  %s926_s1 = inlined_call_operand.vmem [shape: bf16[16,144], index: 1, kind: input, shape index: {}]   ;;  %s927_s2 = inlined_call_operand.vmem [shape: f32[2,16,384], index: 2, kind: output, shape index: {}]  }
   0x1   :  { %s877_s11 = smov 0  }
   0x2 LB: > { %s24_s12 = sadd.s32 1, %s843_s10  ;;  %p735_p0 = scmp.ge.s32.totalorder %s847_s11, 1  ;;  %s847_s11 = sphi %s877_s11, %s12_s11   ;;  %s843_s10 = sphi %s875_s10, %s929_s10   ;;  %s839_s9 = sphi %s873_s9, %s928_s9  }
   0x3   : > { %p26_p1 = scmp.ge.s32.totalorder %s24_s12, 2  ;;  %p132_p2 = scmp.lt.s32.totalorder %s847_s11, 3 }
   0x5   : > { %s931_s12 = smov (%p26_p1, %s24_s12), 0  ;;  %p133_p3 = pnand %p735_p0, %p132_p2 }
   0x6   : > { %p162_p4 = scmp.lt.s32.totalorder (!%p133_p3), %s839_s9, 1  ;;  %v849_v0 = vmov (!%p133_p3), 0   ;;  %s850_s17 = smov (!%p133_p3), 127   ;;  %v824_v6 = vld [vmem:[%s926_s1 + $0x4] ss:$8 sps:$4 sm:$0xff] (!%p133_p3)   ;;  %vm547_vm0 = vcmask (!%p133_p3), 130048  }
   0x7   : > { %136 = sbr.rel (%p133_p3) target bundleno = 413 (0x19d), region = 28  ;;  %594 = vmatprep.subr.bf16.mxu1 (!%p133_p3), %v849_v0  ;;  %s851_s18 = smov (!%p133_p3), 126   ;;  %776 = vmatprep.mubr.msk.bf16.mxu0 (!%p133_p3), %vm547_vm0, %v824_v6  ;;  %vm233_vm1 = vcmask (!%p133_p3), 1039360   ;;  %vm271_vm2 = vcmask (!%p133_p3), 1031168   ;;  %vm309_vm3 = vcmask (!%p133_p3), 900096   ;;  %vm347_vm4 = vcmask (!%p133_p3), 891904  }
   0x8   : > { %s852_s19 = smov (!%p133_p3), 110   ;;  %s853_s20 = smov (!%p133_p3), 109   ;;  %777 = vmatprep.mubr.msk.bf16.mxu1 (!%p133_p3), %vm547_vm0, %v824_v6  ;;  %vm385_vm5 = vcmask (!%p133_p3), 883712   ;;  %vm423_vm6 = vcmask (!%p133_p3), 752640   ;;  %vm461_vm7 = vcmask (!%p133_p3), 744448   ;;  %vm499_vm8 = vcmask (!%p133_p3), 736256  }
   0x9   : > { %s854_s21 = smov (!%p133_p3), 108   ;;  %s855_s22 = smov (!%p133_p3), 92   ;;  %v822_v62 = vld [vmem:[%s926_s1] ss:$8 sps:$4 sm:$0xff] (!%p133_p3)  }
   0xa   : > { %s856_s23 = smov (!%p133_p3), 91   ;;  %s857_s26 = smov (!%p133_p3), 90  }
   0xe   : > { %s933_s9 = smov (!%p162_p4, %s839_s9), 1 }
   0xf   : > { %s780_s13 = sshll.u32 %s933_s9, 5  ;;  %s781_s29 = smul.u32 48, %s933_s9 }
  0x10   : > { %s170_s16 = scalar_lea.vmem %s925_s0, %s780_s13 }
  0x11   : > { %v815_v1 = vld [vmem:[%s170_s16 + $0x4] ss:$16 sps:$4 sm:$0xff]   ;;  %v817_v2 = vld [vmem:[%s170_s16] ss:$16 sps:$4 sm:$0xff]   ;;  %v818_v3 = vld [vmem:[%s170_s16 + $0x8] ss:$16 sps:$4 sm:$0xff]   ;;  %s179_s4 = scalar_lea.vmem %s927_s2, %s781_s29 }
  0x12   : > { %227 = vrot.lane.b32.xlu0 %v815_v1, %s850_s17  ;;  %551 = vmatprep.subr.bf16.mxu0 %v815_v1  ;;  %v820_v4 = vld [vmem:[%s170_s16 + $0xc] ss:$16 sps:$4 sm:$0xff]   ;;  %v821_v5 = vld [vmem:[%s170_s16 + $0x8] ss:$16 sps:$4 sm:$0xff]  }
  0x13   : > { %225 = vrot.lane.b32.xlu1 %v817_v2, %s850_s17  ;;  %552 = vmatpush1.bf16.msra.mxu0 %v817_v2 }
  0x14   : > { %595 = vmatpush1.bf16.msra.mxu1 %v821_v5 }
  0x15   : > { %596 = vmatprep.subr.bf16.mxu1 %v849_v0 }
  0x16   : > { %229 = vrot.lane.b32.xlu0 %v818_v3, %s850_s17 }
  0x17   : > { %231 = vrot.lane.b32.xlu1 %v820_v4, %s850_s17 }
  0x1a   : > { %265 = vrot.lane.b32.xlu0 %v815_v1, %s851_s18 }
  0x1b   : > { %267 = vrot.lane.b32.xlu1 %v818_v3, %s851_s18 }
  0x1e   : > { %263 = vrot.lane.b32.xlu0 %v817_v2, %s851_s18 }
  0x1f   : > { %269 = vrot.lane.b32.xlu1 %v820_v4, %s851_s18 }
  0x22   : > { %303 = vrot.lane.b32.xlu0 %v815_v1, %s852_s19 }
  0x23   : > { %305 = vrot.lane.b32.xlu1 %v818_v3, %s852_s19 }
  0x26   : > { %301 = vrot.lane.b32.xlu0 %v817_v2, %s852_s19 }
  0x27   : > { %307 = vrot.lane.b32.xlu1 %v820_v4, %s852_s19 }
  0x2a   : > { %341 = vrot.lane.b32.xlu0 %v815_v1, %s853_s20 }
  0x2b   : > { %343 = vrot.lane.b32.xlu1 %v818_v3, %s853_s20 }
  0x2e   : > { %339 = vrot.lane.b32.xlu0 %v817_v2, %s853_s20 }
  0x2f   : > { %345 = vrot.lane.b32.xlu1 %v820_v4, %s853_s20 }
  0x32   : > { %379 = vrot.lane.b32.xlu0 %v815_v1, %s854_s21 }
  0x33   : > { %381 = vrot.lane.b32.xlu1 %v818_v3, %s854_s21 }
  0x36   : > { %377 = vrot.lane.b32.xlu0 %v817_v2, %s854_s21 }
  0x37   : > { %383 = vrot.lane.b32.xlu1 %v820_v4, %s854_s21 }
  0x3a   : > { %417 = vrot.lane.b32.xlu0 %v815_v1, %s855_s22 }
  0x3b   : > { %419 = vrot.lane.b32.xlu1 %v818_v3, %s855_s22 }
  0x3e   : > { %415 = vrot.lane.b32.xlu0 %v817_v2, %s855_s22 }
  0x3f   : > { %421 = vrot.lane.b32.xlu1 %v820_v4, %s855_s22 }
  0x42   : > { %455 = vrot.lane.b32.xlu0 %v815_v1, %s856_s23 }
  0x43   : > { %457 = vrot.lane.b32.xlu1 %v818_v3, %s856_s23 }
  0x46   : > { %453 = vrot.lane.b32.xlu0 %v817_v2, %s856_s23 }
  0x47   : > { %459 = vrot.lane.b32.xlu1 %v820_v4, %s856_s23 }
  0x4a   : > { %493 = vrot.lane.b32.xlu0 %v815_v1, %s857_s26 }
  0x4b   : > { %495 = vrot.lane.b32.xlu1 %v818_v3, %s857_s26 }
  0x4e   : > { %491 = vrot.lane.b32.xlu0 %v817_v2, %s857_s26 }
  0x4f   : > { %497 = vrot.lane.b32.xlu1 %v820_v4, %s857_s26 }
  0x84   : > { %v228_v7 = vpop.permute.xlu0 %227 }
  0x85   : > { %v226_v8 = vpop.permute.xlu1 %225 }
  0x86   : > { %v234_v13 = vsel %vm233_vm1, %v226_v8, %v228_v7 }
  0x88   : > { %v230_v9 = vpop.permute.xlu0 %229 }
  0x89   : > { %v232_v10 = vpop.permute.xlu1 %231  ;;  %v235_v11 = vsel %vm233_vm1, %v228_v7, %v230_v9 }
  0x8a   : > { %553 = vmatprep.subr.bf16.mxu0 %v235_v11  ;;  %v236_v12 = vsel %vm233_vm1, %v230_v9, %v232_v10 }
  0x8b   : > { %597 = vmatpush1.bf16.msra.mxu1 %v236_v12  ;;  %554 = vmatpush1.bf16.msra.mxu0 %v234_v13 }
  0x8c   : > { %v266_v14 = vpop.permute.xlu0 %265  ;;  %598 = vmatprep.subr.bf16.mxu1 %v849_v0 }
  0x8d   : > { %v268_v15 = vpop.permute.xlu1 %267 }
  0x8e   : > { %v273_v16 = vsel %vm271_vm2, %v266_v14, %v268_v15 }
  0x8f   : > { %555 = vmatprep.subr.bf16.mxu0 %v273_v16 }
  0x90   : > { %v264_v17 = vpop.permute.xlu0 %263 }
  0x91   : > { %v270_v18 = vpop.permute.xlu1 %269  ;;  %v272_v19 = vsel %vm271_vm2, %v264_v17, %v266_v14 }
  0x92   : > { %556 = vmatpush1.bf16.msra.mxu0 %v272_v19  ;;  %v274_v20 = vsel %vm271_vm2, %v268_v15, %v270_v18 }
  0x93   : > { %599 = vmatpush1.bf16.msra.mxu1 %v274_v20 }
  0x94   : > { %v304_v21 = vpop.permute.xlu0 %303  ;;  %600 = vmatprep.subr.bf16.mxu1 %v849_v0 }
  0x95   : > { %v306_v22 = vpop.permute.xlu1 %305 }
  0x96   : > { %v311_v23 = vsel %vm309_vm3, %v304_v21, %v306_v22 }
  0x97   : > { %557 = vmatprep.subr.bf16.mxu0 %v311_v23 }
  0x98   : > { %v302_v24 = vpop.permute.xlu0 %301 }
  0x99   : > { %v308_v25 = vpop.permute.xlu1 %307  ;;  %v310_v26 = vsel %vm309_vm3, %v302_v24, %v304_v21 }
  0x9a   : > { %558 = vmatpush1.bf16.msra.mxu0 %v310_v26  ;;  %v312_v27 = vsel %vm309_vm3, %v306_v22, %v308_v25 }
  0x9b   : > { %601 = vmatpush1.bf16.msra.mxu1 %v312_v27 }
  0x9c   : > { %v342_v28 = vpop.permute.xlu0 %341  ;;  %602 = vmatprep.subr.bf16.mxu1 %v849_v0 }
  0x9d   : > { %v344_v29 = vpop.permute.xlu1 %343 }
  0x9e   : > { %v349_v30 = vsel %vm347_vm4, %v342_v28, %v344_v29 }
  0x9f   : > { %559 = vmatprep.subr.bf16.mxu0 %v349_v30 }
  0xa0   : > { %v340_v31 = vpop.permute.xlu0 %339 }
  0xa1   : > { %v346_v32 = vpop.permute.xlu1 %345  ;;  %v348_v33 = vsel %vm347_vm4, %v340_v31, %v342_v28 }
  0xa2   : > { %560 = vmatpush1.bf16.msra.mxu0 %v348_v33  ;;  %v350_v34 = vsel %vm347_vm4, %v344_v29, %v346_v32 }
  0xa3   : > { %603 = vmatpush1.bf16.msra.mxu1 %v350_v34 }
  0xa4   : > { %v380_v35 = vpop.permute.xlu0 %379  ;;  %604 = vmatprep.subr.bf16.mxu1 %v849_v0 }
  0xa5   : > { %v382_v36 = vpop.permute.xlu1 %381 }
  0xa6   : > { %v387_v37 = vsel %vm385_vm5, %v380_v35, %v382_v36 }
  0xa7   : > { %561 = vmatprep.subr.bf16.mxu0 %v387_v37 }
  0xa8   : > { %v378_v38 = vpop.permute.xlu0 %377 }
  0xa9   : > { %v384_v39 = vpop.permute.xlu1 %383  ;;  %v386_v40 = vsel %vm385_vm5, %v378_v38, %v380_v35 }
  0xaa   : > { %562 = vmatpush1.bf16.msra.mxu0 %v386_v40  ;;  %v388_v41 = vsel %vm385_vm5, %v382_v36, %v384_v39 }
  0xab   : > { %605 = vmatpush1.bf16.msra.mxu1 %v388_v41 }
  0xac   : > { %v418_v42 = vpop.permute.xlu0 %417  ;;  %606 = vmatprep.subr.bf16.mxu1 %v849_v0 }
  0xad   : > { %v420_v43 = vpop.permute.xlu1 %419 }
  0xae   : > { %v425_v44 = vsel %vm423_vm6, %v418_v42, %v420_v43 }
  0xaf   : > { %563 = vmatprep.subr.bf16.mxu0 %v425_v44 }
  0xb0   : > { %v416_v45 = vpop.permute.xlu0 %415 }
  0xb1   : > { %v422_v46 = vpop.permute.xlu1 %421  ;;  %v424_v47 = vsel %vm423_vm6, %v416_v45, %v418_v42 }
  0xb2   : > { %564 = vmatpush1.bf16.msra.mxu0 %v424_v47  ;;  %v426_v48 = vsel %vm423_vm6, %v420_v43, %v422_v46 }
  0xb3   : > { %607 = vmatpush1.bf16.msra.mxu1 %v426_v48 }
  0xb4   : > { %v456_v49 = vpop.permute.xlu0 %455  ;;  %608 = vmatprep.subr.bf16.mxu1 %v849_v0 }
  0xb5   : > { %v458_v50 = vpop.permute.xlu1 %457 }
  0xb6   : > { %v463_v51 = vsel %vm461_vm7, %v456_v49, %v458_v50 }
  0xb7   : > { %565 = vmatprep.subr.bf16.mxu0 %v463_v51 }
  0xb8   : > { %v454_v52 = vpop.permute.xlu0 %453 }
  0xb9   : > { %v460_v53 = vpop.permute.xlu1 %459  ;;  %v462_v54 = vsel %vm461_vm7, %v454_v52, %v456_v49 }
  0xba   : > { %566 = vmatpush1.bf16.msra.mxu0 %v462_v54  ;;  %v464_v55 = vsel %vm461_vm7, %v458_v50, %v460_v53 }
  0xbb   : > { %609 = vmatpush1.bf16.msra.mxu1 %v464_v55 }
  0xbc   : > { %v494_v56 = vpop.permute.xlu0 %493  ;;  %610 = vmatprep.subr.bf16.mxu1 %v849_v0 }
  0xbd   : > { %v496_v57 = vpop.permute.xlu1 %495 }
  0xbe   : > { %v501_v58 = vsel %vm499_vm8, %v494_v56, %v496_v57 }
  0xbf   : > { %567 = vmatprep.subr.bf16.mxu0 %v501_v58 }
  0xc0   : > { %v492_v59 = vpop.permute.xlu0 %491 }
  0xc1   : > { %v498_v60 = vpop.permute.xlu1 %497  ;;  %v500_v61 = vsel %vm499_vm8, %v492_v59, %v494_v56 }
  0xc2   : > { %568 = vmatpush1.bf16.msra.mxu0 %v500_v61  ;;  %v502_v63 = vsel %vm499_vm8, %v496_v57, %v498_v60 }
  0xc3   : > { %611 = vmatpush1.bf16.msra.mxu1 %v502_v63 }
  0xc5   : > { %584 = vmatmul.mubr.bf16.vlgmr.msra.gmra.mrb[0].mxu0 %v822_v62 }
  0xc6   : > { %627 = vmatmul.mubr.bf16.vlgmr.msra.gmra.mrb[0].mxu1 %v822_v62 }
 0x198   : > { %v585_v0 = vpop.f32.mrb[0].mxu0 }
 0x199   : > { %635 = vst [vmem:[%s179_s4] sm:$0xff] %v585_v0  ;;  %v628_v1 = vpop.f32.mrb[0].mxu1  ;;  %v587_v2 = vpop.f32.mrb[1].mxu0 }
 0x19a   : > { %637 = vst [vmem:[%s179_s4 + $0x10] sm:$0xff] %v628_v1  ;;  %636 = vst [vmem:[%s179_s4 + $0x8] sm:$0xff] %v587_v2  ;;  %v630_v3 = vpop.f32.mrb[1].mxu1  ;;  %v589_v4 = vpop.f32.mrb[2].mxu0 }
 0x19b   : > { %638 = vst [vmem:[%s179_s4 + $0x18] sm:$0xff] %v589_v4  ;;  %v631_v5 = vpop.f32.mrb[2].mxu1  ;;  %v591_v6 = vpop.f32.mrb[3].mxu0 }
 0x19c   : > { %640 = vst [vmem:[%s179_s4 + $0x28] sm:$0xff] %v631_v5  ;;  %639 = vst [vmem:[%s179_s4 + $0x20] sm:$0xff] %v591_v6  ;;  %v633_v7 = vpop.f32.mrb[3].mxu1 }
 0x19d PF: > { %s12_s11 = sadd.s32 1, %s847_s11   ;;  %s928_s9 = smov %s843_s10 }
 0x19e   : > { %p9_p5 = scmp.ge.s32.totalorder %s12_s11, 4   ;;  %s929_s10 = smov %s931_s12 }
 0x1a0   :  { %11 = sbr.rel (!%p9_p5) target bundleno = 2 (0x2), region = 58 }

</bundles_post_ra>
